<compile_context>
chip_gen: v6e
topology: v6e:2x2x1
jax: 0.10.0
libtpu: 0.0.40
codegen_flags: <defaults>
</compile_context>

<pallas_src>
import jax
import jax.numpy as jnp
from jax.experimental import pallas as pl
from jax.experimental.pallas import tpu as pltpu

IN_FEATURES = 64
OUT_FEATURES = 16

FOLD = 8                                # batch rows folded per packed row
PACKED_IN = IN_FEATURES * FOLD          # 512 (multiple of 128 lanes)
PACKED_OUT = OUT_FEATURES * FOLD        # 128 (exactly one lane-width)
DEFAULT_TILE_R = 2048                   # packed rows / tile == 16384 batch rows
                                        # (x block 4 MiB; ~10.5 MiB w/ dbl-buf)


def linear_kernel(x_ref, w_ref, b_ref, o_ref):
    # Single MXU matmul + bias add per tile; all operands resident in VMEM.
    acc = jnp.dot(x_ref[...], w_ref[...], preferred_element_type=jnp.float32)
    o_ref[...] = (acc + b_ref[...]).astype(o_ref.dtype)


def pack_params(w_t, b):
    """w_t: [64, 16], b: [1, 16] -> block-diagonal [512, 128] W and [1, 128] b."""
    w_bd = jnp.zeros((PACKED_IN, PACKED_OUT), w_t.dtype)
    for j in range(FOLD):
        w_bd = w_bd.at[
            j * IN_FEATURES:(j + 1) * IN_FEATURES,
            j * OUT_FEATURES:(j + 1) * OUT_FEATURES,
        ].set(w_t)
    b_tiled = jnp.tile(b.reshape(1, OUT_FEATURES), (1, FOLD))
    return w_bd, b_tiled


def encoder_forward(x, w_bd, b_tiled, *, tile_r=DEFAULT_TILE_R):
    """x: [B, 64] f32; w_bd: [512, 128]; b_tiled: [1, 128] -> [B, 16]."""
    B = x.shape[0]

    # Packed rows and tile size (multiple of 8 sublanes, capped by tile_r).
    r = -(-B // FOLD)                       # ceil(B / 8) packed rows
    tr = min(tile_r, max(8, ((r + 7) // 8) * 8))
    num_tiles = pl.cdiv(r, tr)              # ragged last tile handled by Pallas

    # Pad x only to a multiple of FOLD (<= 7 rows); skip entirely when aligned.
    pad_rows = r * FOLD - B
    xp = jnp.pad(x, ((0, pad_rows), (0, 0))) if pad_rows else x
    # Pure row-major reshape (no data movement): fold 8 rows per packed row.
    x_packed = xp.reshape(r, PACKED_IN)

    out_packed = pl.pallas_call(
        linear_kernel,
        out_shape=jax.ShapeDtypeStruct((r, PACKED_OUT), x.dtype),
        grid_spec=pltpu.PrefetchScalarGridSpec(
            num_scalar_prefetch=0,
            grid=(num_tiles,),
            in_specs=[
                # x: tiled along the (packed) batch axis -> auto double-buffer.
                pl.BlockSpec((tr, PACKED_IN), lambda i: (i, 0)),
                # W / bias: constant index_map -> VMEM-resident across grid.
                pl.BlockSpec((PACKED_IN, PACKED_OUT), lambda i: (0, 0)),
                pl.BlockSpec((1, PACKED_OUT), lambda i: (0, 0)),
            ],
            out_specs=pl.BlockSpec((tr, PACKED_OUT), lambda i: (i, 0)),
        ),
        compiler_params=pltpu.CompilerParams(
            # Batch tiles are independent -> shard across TCs on v7x.
            dimension_semantics=("parallel",),
            # Explicit scoped-VMEM headroom for the larger tile (safe on v5e).
            vmem_limit_bytes=32 * 1024 * 1024,
        ),
        cost_estimate=pl.CostEstimate(
            # Actual MXU work of the packed (block-diagonal) matmul.
            flops=2 * num_tiles * tr * PACKED_IN * PACKED_OUT,
            bytes_accessed=4 * (r * PACKED_IN + r * PACKED_OUT
                                + PACKED_IN * PACKED_OUT + PACKED_OUT),
            transcendentals=0,
        ),
    )(x_packed, w_bd, b_tiled)

    # Unfold packed rows back to [B, 16]; padding / ragged-tile rows dropped.
    return out_packed.reshape(r * FOLD, OUT_FEATURES)[:B]


def init_params(key):
    # Deterministic init mimicking nn.Linear's U(-k, k), k = 1/sqrt(in_features).
    kw, kb = jax.random.split(key)
    bound = 1.0 / (IN_FEATURES ** 0.5)
    # PyTorch stores weight as [out, in]; keep the transposed [in, out] layout.
    w = jax.random.uniform(
        kw, (OUT_FEATURES, IN_FEATURES), jnp.float32, -bound, bound
    )
    b = jax.random.uniform(kb, (OUT_FEATURES,), jnp.float32, -bound, bound)
    return w.T, b.reshape(1, OUT_FEATURES)


if __name__ == "__main__":
    key = jax.random.PRNGKey(0)
    k_x, k_p = jax.random.split(key)

    w_t, b = init_params(k_p)
    # Pack parameters once (block-diagonal weight, tiled bias).
    w_bd, b_tiled = pack_params(w_t, b)

    # Main small-shape check (batch multiple of FOLD -> zero-copy repack path).
    batch = 8
    x = jax.random.normal(k_x, (batch, IN_FEATURES), dtype=jnp.float32)
    out = jax.block_until_ready(encoder_forward(x, w_bd, b_tiled))
    ref = x @ w_t + b
    assert out.shape == (batch, OUT_FEATURES)
    assert jnp.allclose(out, ref, atol=1e-5, rtol=1e-5)

    # Secondary check: batch not a multiple of 8 (exercises the <=7-row pad
    # and the ragged last Pallas block).
    batch2 = 10
    x2 = jax.random.normal(k_x, (batch2, IN_FEATURES), dtype=jnp.float32)
    out2 = jax.block_until_ready(encoder_forward(x2, w_bd, b_tiled))
    ref2 = x2 @ w_t + b
    assert out2.shape == (batch2, OUT_FEATURES)
    assert jnp.allclose(out2, ref2, atol=1e-5, rtol=1e-5)

    print("KERNEL_OK")
</pallas_src>

<mosaic_0001>
module attributes {stable_mosaic.version = 11 : i64} {
  func.func @linear_kernel(%arg0: i32, %arg1: memref<8x512xf32, #tpu.memory_space<vmem>>, %arg2: memref<512x128xf32, #tpu.memory_space<vmem>>, %arg3: memref<1x128xf32, #tpu.memory_space<vmem>>, %arg4: memref<8x128xf32, #tpu.memory_space<vmem>>) attributes {dimension_semantics = [#tpu.dimension_semantics<parallel>], iteration_bounds = array<i64: 1>, scalar_prefetch = 0 : i64, scratch_operands = 0 : i64, tpu.core_type = #tpu.core_type<tc>, window_params = [{transform_indices = @transform_0, window_bounds = array<i64: 8, 512>}, {pipeline_mode = #tpu.pipeline_mode<synchronous>, transform_indices = @transform_1, window_bounds = array<i64: 512, 128>}, {pipeline_mode = #tpu.pipeline_mode<synchronous>, transform_indices = @transform_2, window_bounds = array<i64: 1, 128>}, {transform_indices = @transform_3, window_bounds = array<i64: 8, 128>}]} {
    %c0 = arith.constant 0 : index
    %c0_0 = arith.constant 0 : index
    %0 = vector.load %arg1[%c0, %c0_0] : memref<8x512xf32, #tpu.memory_space<vmem>>, vector<8x512xf32>
    %c0_1 = arith.constant 0 : index
    %c0_2 = arith.constant 0 : index
    %1 = vector.load %arg2[%c0_1, %c0_2] : memref<512x128xf32, #tpu.memory_space<vmem>>, vector<512x128xf32>
    %cst = arith.constant dense<0.000000e+00> : vector<8x128xf32>
    %2 = tpu.matmul %0, %1, %cst {dimension_numbers = #tpu.dot_dimension_numbers<[1], [0], [0], [1], [0, 0, 1, 1], [], []>} : vector<8x512xf32>, vector<512x128xf32>, vector<8x128xf32> -> vector<8x128xf32>
    %c0_3 = arith.constant 0 : index
    %c0_4 = arith.constant 0 : index
    %3 = vector.load %arg3[%c0_3, %c0_4] : memref<1x128xf32, #tpu.memory_space<vmem>>, vector<1x128xf32>
    %4 = vector.broadcast %3 : vector<1x128xf32> to vector<8x128xf32>
    %5 = arith.addf %2, %4 : vector<8x128xf32>
    %c0_5 = arith.constant 0 : index
    %c0_6 = arith.constant 0 : index
    %6 = vector.load %arg4[%c0_5, %c0_6] : memref<8x128xf32, #tpu.memory_space<vmem>>, vector<8x128xf32>
    tpu.vector_store %arg4[%c0_5, %c0_6], %5 {strides = array<i32>} : memref<8x128xf32, #tpu.memory_space<vmem>>, vector<8x128xf32>,
    return
  }
  func.func @transform_0(%arg0: i32) -> (i32, i32) {
    %c0_i32 = arith.constant 0 : i32
    %c0_i32_0 = arith.constant 0 : i32
    return %arg0, %c0_i32 : i32, i32
  }
  func.func @transform_1(%arg0: i32) -> (i32, i32) {
    %c0_i32 = arith.constant 0 : i32
    %c0_i32_0 = arith.constant 0 : i32
    %c0_i32_1 = arith.constant 0 : i32
    return %c0_i32, %c0_i32_0 : i32, i32
  }
  func.func @transform_2(%arg0: i32) -> (i32, i32) {
    %c0_i32 = arith.constant 0 : i32
    %c0_i32_0 = arith.constant 0 : i32
    %c0_i32_1 = arith.constant 0 : i32
    return %c0_i32, %c0_i32_0 : i32, i32
  }
  func.func @transform_3(%arg0: i32) -> (i32, i32) {
    %c0_i32 = arith.constant 0 : i32
    %c0_i32_0 = arith.constant 0 : i32
    return %arg0, %c0_i32 : i32, i32
  }
}

</mosaic_0001>

<bundles_post_ra>
// kernel: tpu_custom_call.1
= control target key start
LH: loop header
LB: loop body
LE: loop exit
PB: predicated region body
PF: predicated region fallthrough
CT: control target
= control target key end

     0   :  { %8 = vsyncpa [#allocation3], 0  ;;  %s558_s0 = inlined_call_operand.hbm [shape: f32[1,512], index: 0, kind: input, shape index: {}]   ;;  %s559_s1 = inlined_call_operand.hbm [shape: f32[512,128], index: 1, kind: input, shape index: {}]   ;;  %s560_s2 = inlined_call_operand.vmem [shape: f32[1,128], index: 2, kind: input, shape index: {}]   ;;  %s561_s3 = inlined_call_operand.hbm [shape: f32[1,128], index: 3, kind: output, shape index: {}]  }
   0x1   :  { %9 = vsyncpa [#allocation6], 0 }
   0x2   :  { %10 = vsyncpa [#allocation4], 0 }
   0x3   :  { %15 = vsyncadd [#allocation3], 448  ;;  %s516_s12 = smov [#allocation2]  }
   0x4   :  { %s16_s13 = sshll.u32 %s516_s12, 4  ;;  %s17_s13 = int_to_ptr.vmem [resolvable:$true] %s16_s13 }
   0x5   :  { %s458_s14 = scalar_lea.vmem %s17_s13, 64  ;;  %s462_s15 = scalar_lea.vmem %s17_s13, 512 }
   0x6   :  { %p459_p0 = scmp.ne.s32.totalorder %s17_s13, %s458_s14  ;;  %p463_p1 = scmp.lt.s32.totalorder %s17_s13, %s17_s13 }
   0x7   :  { %p464_p2 = scmp.lt.s32.totalorder %s462_s15, %s458_s14 }
   0x9   :  { %p465_p3 = por %p464_p2, %p463_p1 }
   0xb   :  { %p466_p4 = pnand %p465_p3, %p459_p0 }
   0xd   :  { %469 = shalt.err (!%p466_p4)
}
   0xe   :  { %s517_s16 = smov 64   ;;  %s518_s17 = smov 4  }
   0xf   :  { %22 = dma.hbm_to_vmem [thread:$0]  %s558_s0, 64, %s17_s13, [#allocation3], %s517_s16, %s517_s16, %s518_s17  }
  0x10   :  { %s519_s20 = smov [#allocation5]  }
  0x11   :  { %s28_s21 = sshll.u32 %s519_s20, 4  ;;  %s29_s21 = int_to_ptr.vmem [resolvable:$true] %s28_s21 }
  0x12   :  { %s478_s22 = scalar_lea.vmem %s29_s21, 8192  ;;  %p483_p6 = scmp.lt.s32.totalorder %s29_s21, %s29_s21 }
  0x13   :  { %p479_p5 = scmp.ne.s32.totalorder %s29_s21, %s478_s22  ;;  %p484_p7 = scmp.lt.s32.totalorder %s478_s22, %s478_s22 }
  0x15   :  { %p485_p8 = por %p484_p7, %p483_p6 }
  0x17   :  { %p486_p9 = pnand %p485_p8, %p479_p5 }
  0x19   :  { %489 = shalt.err (!%p486_p9)
}
  0x1a   :  { %s520_s23 = smov 128   ;;  %s521_s24 = smov 8  }
  0x1b   :  { %34 = dma.hbm_to_vmem [thread:$0]  %s559_s1, 8192, %s29_s21, [#allocation6], %s520_s23, %s520_s23, %s521_s24  }
  0x1c   :  { %510 = dma.done.wait [#allocation3], 512  }
  0x1d   :  { %511 = vsyncadd [#allocation3], 4294966784 }
  0x1e   :  { %512 = dma.done.wait [#allocation6], 8192  }
  0x1f   :  { %513 = vsyncadd [#allocation6], 4294959104  ;;  %v82_v0 = vld [vmem:[#allocation5 + $0xf8] sm:$0xff]  ;;  %v81_v4 = vld [vmem:[#allocation5 + $0xf0] sm:$0xff]  ;;  %v522_v32 = vmov 1966171168   ;;  %v137_v34 = vlaneseq }
  0x20   :  { %v114_v1 = vld [vmem:[#allocation5 + $0x1f8] sm:$0xff]  ;;  %362 = vmatprep.subr.mxu0 %v82_v0  ;;  %v113_v5 = vld [vmem:[#allocation5 + $0x1f0] sm:$0xff]  ;;  %v80_v8 = vld [vmem:[#allocation5 + $0xe8] sm:$0xff]  ;;  %v135_v33 = vunpack.c.l.s4 %v522_v32 }
  0x21   :  { %v66_v2 = vld [vmem:[#allocation5 + $0x78] sm:$0xff]  ;;  %397 = vmatprep.subr.mxu1 %v114_v1  ;;  %v65_v6 = vld [vmem:[#allocation5 + $0x70] sm:$0xff]  ;;  %v112_v9 = vld [vmem:[#allocation5 + $0x1e8] sm:$0xff]  ;;  %v138_v45 = vshrl.u32 %v137_v34, 7 }
  0x22   :  { %v98_v3 = vld [vmem:[#allocation5 + $0x178] sm:$0xff]  ;;  %363 = vmatpush3.msra.mxu0 %v66_v2  ;;  %v97_v7 = vld [vmem:[#allocation5 + $0x170] sm:$0xff]  ;;  %v64_v10 = vld [vmem:[#allocation5 + $0x68] sm:$0xff]  ;;  %v136_v44 = vunpack.c.0.s8 %v135_v33 }
  0x23   :  { %398 = vmatpush3.msra.mxu1 %v98_v3  ;;  %364 = vmatprep.subr.mxu0 %v81_v4  ;;  %v96_v11 = vld [vmem:[#allocation5 + $0x168] sm:$0xff]  ;;  %v79_v12 = vld [vmem:[#allocation5 + $0xe0] sm:$0xff]  ;;  %v78_v16 = vld [vmem:[#allocation5 + $0xd8] sm:$0xff] }
  0x24   :  { %399 = vmatprep.subr.mxu1 %v113_v5  ;;  %365 = vmatpush3.msra.mxu0 %v65_v6  ;;  %v111_v13 = vld [vmem:[#allocation5 + $0x1e0] sm:$0xff]  ;;  %v110_v17 = vld [vmem:[#allocation5 + $0x1d8] sm:$0xff]  ;;  %v77_v20 = vld [vmem:[#allocation5 + $0xd0] sm:$0xff]  ;;  %v139_v57 = vsub.s32 %v136_v44, %v138_v45 }
  0x25   :  { %400 = vmatpush3.msra.mxu1 %v97_v7  ;;  %366 = vmatprep.subr.mxu0 %v80_v8  ;;  %v63_v14 = vld [vmem:[#allocation5 + $0x60] sm:$0xff]  ;;  %v62_v18 = vld [vmem:[#allocation5 + $0x58] sm:$0xff]  ;;  %v109_v21 = vld [vmem:[#allocation5 + $0x1d0] sm:$0xff] }
  0x26   :  { %401 = vmatprep.subr.mxu1 %v112_v9  ;;  %v95_v15 = vld [vmem:[#allocation5 + $0x160] sm:$0xff]  ;;  %367 = vmatpush3.msra.mxu0 %v64_v10  ;;  %v94_v19 = vld [vmem:[#allocation5 + $0x158] sm:$0xff]  ;;  %v61_v22 = vld [vmem:[#allocation5 + $0x50] sm:$0xff] }
  0x27   :  { %402 = vmatpush3.msra.mxu1 %v96_v11  ;;  %368 = vmatprep.subr.mxu0 %v79_v12  ;;  %v93_v23 = vld [vmem:[#allocation5 + $0x150] sm:$0xff]  ;;  %v76_v24 = vld [vmem:[#allocation5 + $0xc8] sm:$0xff]  ;;  %v75_v28 = vld [vmem:[#allocation5 + $0xc0] sm:$0xff] }
  0x28   :  { %403 = vmatprep.subr.mxu1 %v111_v13  ;;  %369 = vmatpush3.msra.mxu0 %v63_v14  ;;  %v108_v25 = vld [vmem:[#allocation5 + $0x1c8] sm:$0xff]  ;;  %v107_v29 = vld [vmem:[#allocation5 + $0x1c0] sm:$0xff]  ;;  %v74_v35 = vld [vmem:[#allocation5 + $0xb8] sm:$0xff] }
  0x29   :  { %404 = vmatpush3.msra.mxu1 %v95_v15  ;;  %370 = vmatprep.subr.mxu0 %v78_v16  ;;  %v60_v26 = vld [vmem:[#allocation5 + $0x48] sm:$0xff]  ;;  %v59_v30 = vld [vmem:[#allocation5 + $0x40] sm:$0xff]  ;;  %v106_v36 = vld [vmem:[#allocation5 + $0x1b8] sm:$0xff] }
  0x2a   :  { %405 = vmatprep.subr.mxu1 %v110_v17  ;;  %371 = vmatpush3.msra.mxu0 %v62_v18  ;;  %v92_v27 = vld [vmem:[#allocation5 + $0x148] sm:$0xff]  ;;  %v91_v31 = vld [vmem:[#allocation5 + $0x140] sm:$0xff]  ;;  %v58_v37 = vld [vmem:[#allocation5 + $0x38] sm:$0xff] }
  0x2b   :  { %406 = vmatpush3.msra.mxu1 %v94_v19  ;;  %372 = vmatprep.subr.mxu0 %v77_v20  ;;  %v90_v38 = vld [vmem:[#allocation5 + $0x138] sm:$0xff]  ;;  %v73_v39 = vld [vmem:[#allocation5 + $0xb0] sm:$0xff]  ;;  %v72_v43 = vld [vmem:[#allocation5 + $0xa8] sm:$0xff] }
  0x2c   :  { %407 = vmatprep.subr.mxu1 %v109_v21  ;;  %373 = vmatpush3.msra.mxu0 %v61_v22  ;;  %v105_v40 = vld [vmem:[#allocation5 + $0x1b0] sm:$0xff]  ;;  %v104_v46 = vld [vmem:[#allocation5 + $0x1a8] sm:$0xff]  ;;  %v71_v49 = vld [vmem:[#allocation5 + $0xa0] sm:$0xff] }
  0x2d   :  { %408 = vmatpush3.msra.mxu1 %v93_v23  ;;  %374 = vmatprep.subr.mxu0 %v76_v24  ;;  %v57_v41 = vld [vmem:[#allocation5 + $0x30] sm:$0xff]  ;;  %v56_v47 = vld [vmem:[#allocation5 + $0x28] sm:$0xff]  ;;  %v103_v50 = vld [vmem:[#allocation5 + $0x1a0] sm:$0xff] }
  0x2e   :  { %409 = vmatprep.subr.mxu1 %v108_v25  ;;  %375 = vmatpush3.msra.mxu0 %v60_v26  ;;  %v89_v42 = vld [vmem:[#allocation5 + $0x130] sm:$0xff]  ;;  %v88_v48 = vld [vmem:[#allocation5 + $0x128] sm:$0xff]  ;;  %v55_v51 = vld [vmem:[#allocation5 + $0x20] sm:$0xff] }
  0x2f   :  { %410 = vmatpush3.msra.mxu1 %v92_v27  ;;  %376 = vmatprep.subr.mxu0 %v75_v28  ;;  %v87_v52 = vld [vmem:[#allocation5 + $0x120] sm:$0xff]  ;;  %v70_v53 = vld [vmem:[#allocation5 + $0x98] sm:$0xff]  ;;  %v69_v58 = vld [vmem:[#allocation5 + $0x90] sm:$0xff] }
  0x30   :  { %411 = vmatprep.subr.mxu1 %v107_v29  ;;  %377 = vmatpush3.msra.mxu0 %v59_v30  ;;  %v102_v54 = vld [vmem:[#allocation5 + $0x198] sm:$0xff]  ;;  %v101_v59 = vld [vmem:[#allocation5 + $0x190] sm:$0xff]  ;;  %v446_v60 = vld.sshfl [vmem:[#allocation2] sm:$0xff pattern:$0x75316420] }
  0x31   :  { %412 = vmatpush3.msra.mxu1 %v91_v31  ;;  %378 = vmatprep.subr.mxu0 %v74_v35  ;;  %v54_v55 = vld [vmem:[#allocation5 + $0x18] sm:$0xff]  ;;  %v447_v61 = vld.sshfl [vmem:[#allocation2 + $0x8] sm:$0xff pattern:$0x75316420]  ;;  %v53_v0 = vld [vmem:[#allocation5 + $0x10] sm:$0xff] }
  0x32   :  { %413 = vmatprep.subr.mxu1 %v106_v36  ;;  %379 = vmatpush3.msra.mxu0 %v58_v37  ;;  %v86_v56 = vld [vmem:[#allocation5 + $0x118] sm:$0xff]  ;;  %v448_v62 = vld.sshfl [vmem:[#allocation2 + $0x10] sm:$0xff pattern:$0x75316420]  ;;  %v68_v2 = vld [vmem:[#allocation5 + $0x88] sm:$0xff]  ;;  %v163_v8 = vcombine.high %v446_v60, %v447_v61  ;;  %v162_v10 = vcombine.low %v446_v60, %v447_v61 }
  0x33   :  { %414 = vmatpush3.msra.mxu1 %v90_v38  ;;  %380 = vmatprep.subr.mxu0 %v73_v39  ;;  %v449_v63 = vld.sshfl [vmem:[#allocation2 + $0x18] sm:$0xff pattern:$0x75316420]  ;;  %v85_v1 = vld [vmem:[#allocation5 + $0x110] sm:$0xff]  ;;  %v100_v3 = vld [vmem:[#allocation5 + $0x188] sm:$0xff] }
  0x34   :  { %415 = vmatprep.subr.mxu1 %v105_v40  ;;  %381 = vmatpush3.msra.mxu0 %v57_v41  ;;  %v52_v4 = vld [vmem:[#allocation5 + $0x8] sm:$0xff]  ;;  %v67_v6 = vld [vmem:[#allocation5 + $0x80] sm:$0xff]  ;;  %v165_v9 = vcombine.high %v448_v62, %v449_v63  ;;  %v164_v13 = vcombine.low %v448_v62, %v449_v63  ;;  %v179_v14 = vrot.slane %v163_v8, %v139_v57 }
  0x35   :  { %416 = vmatpush3.msra.mxu1 %v89_v42  ;;  %382 = vmatprep.subr.mxu0 %v72_v43  ;;  %v84_v5 = vld [vmem:[#allocation5 + $0x108] sm:$0xff]  ;;  %v99_v7 = vld [vmem:[#allocation5 + $0x180] sm:$0xff]  ;;  %v172_v16 = vrot.slane %v162_v10, %v139_v57 }
  0x36   :  { %417 = vmatprep.subr.mxu1 %v104_v46  ;;  %383 = vmatpush3.msra.mxu0 %v56_v47  ;;  %v51_v11 = vld [vmem:[#allocation5] sm:$0xff]  ;;  %v193_v15 = vrot.slane %v165_v9, %v139_v57  ;;  %v186_v17 = vrot.slane %v164_v13, %v139_v57 }
  0x37   :  { %418 = vmatpush3.msra.mxu1 %v88_v48  ;;  %384 = vmatprep.subr.mxu0 %v71_v49  ;;  %v83_v12 = vld [vmem:[#allocation5 + $0x100] sm:$0xff] }
  0x38   :  { %419 = vmatprep.subr.mxu1 %v103_v50  ;;  %385 = vmatpush3.msra.mxu0 %v55_v51  ;;  %v196_v18 = vcombine.low %v179_v14, %v193_v15  ;;  %v197_v19 = vcombine.high %v179_v14, %v193_v15  ;;  %v194_v20 = vcombine.low %v172_v16, %v186_v17  ;;  %v361_v24 = vld [vmem:[%s560_s2] ss:$0 sm:$0xff] }
  0x39   :  { %420 = vmatpush3.msra.mxu1 %v87_v52  ;;  %386 = vmatprep.subr.mxu0 %v70_v53  ;;  %v195_v21 = vcombine.high %v172_v16, %v186_v17 }
  0x3a   :  { %421 = vmatprep.subr.mxu1 %v102_v54  ;;  %387 = vmatpush3.msra.mxu0 %v54_v55 }
  0x3b   :  { %422 = vmatpush3.msra.mxu1 %v86_v56  ;;  %388 = vmatprep.subr.mxu0 %v69_v58 }
  0x3c   :  { %423 = vmatprep.subr.mxu1 %v101_v59  ;;  %389 = vmatpush3.msra.mxu0 %v53_v0 }
  0x3d   :  { %424 = vmatpush3.msra.mxu1 %v85_v1  ;;  %390 = vmatprep.subr.mxu0 %v68_v2 }
  0x3e   :  { %425 = vmatprep.subr.mxu1 %v100_v3  ;;  %391 = vmatpush3.msra.mxu0 %v52_v4 }
  0x3f   :  { %426 = vmatpush3.msra.mxu1 %v84_v5  ;;  %392 = vmatprep.subr.mxu0 %v67_v6 }
  0x40   :  { %427 = vmatprep.subr.mxu1 %v99_v7  ;;  %393 = vmatpush3.msra.mxu0 %v51_v11 }
  0x41   :  { %428 = vmatpush3.msra.mxu1 %v83_v12  ;;  %266 = vmatprep.mubr.f32.mxu0 %v196_v18 }
  0x42   :  { %336 = vmatprep.mubr.f32.mxu1 %v197_v19  ;;  %267 = vmatmul.mubr.f32.vlgmr.msra.gmra.mxu0 %v194_v20 }
  0x43   :  { %337 = vmatmul.mubr.f32.vlgmr.msra.gmra.mxu1 %v195_v21 }
 0x102   :  { %v394_v22 = vpop.f32.mrf.mxu0 }
 0x103   :  { %v429_v23 = vpop.f32.mrf.mxu1 }
 0x104   :  { %v395_v25 = vpop.f32.mrf.mxu0 }
 0x105   :  { %v430_v26 = vpop.f32.mrf.mxu1  ;;  %v396_v27 = vadd.f32 %v395_v25, %v394_v22 }
 0x106   :  { %v431_v29 = vadd.f32 %v430_v26, %v429_v23 }
 0x107   :  { %v269_v28 = vadd.f32 %v396_v27, %v361_v24 }
 0x109   :  { %v339_v30 = vadd.f32 %v431_v29, %v269_v28 }
 0x10b   :  { %342 = vst [vmem:[#allocation7] sm:$0xff] %v339_v30 }
 0x10c   :  { %347 = vsyncadd [#allocation4], 112  ;;  %s523_s27 = smov [#allocation7]  }
 0x10d   :  { %s348_s28 = sshll.u32 %s523_s27, 4  ;;  %s349_s28 = int_to_ptr.vmem [resolvable:$true] %s348_s28 }
 0x10e   :  { %s490_s29 = scalar_lea.vmem %s349_s28, 16  ;;  %s494_s30 = scalar_lea.vmem %s349_s28, 128 }
 0x10f   :  { %p491_p10 = scmp.ne.s32.totalorder %s349_s28, %s490_s29  ;;  %p495_p11 = scmp.lt.s32.totalorder %s349_s28, %s349_s28 }
 0x110   :  { %p496_p12 = scmp.lt.s32.totalorder %s494_s30, %s490_s29 }
 0x112   :  { %p497_p13 = por %p496_p12, %p495_p11 }
 0x114   :  { %p498_p0 = pnand %p497_p13, %p491_p10 }
 0x116   :  { %501 = shalt.err (!%p498_p0)
}
 0x117   :  { %s524_s2 = smov 16   ;;  %s525_s4 = smov 1  }
 0x118   :  { %354 = dma.vmem_to_hbm [thread:$0]  %s349_s28, 16, %s561_s3, [#allocation4], %s524_s2, %s524_s2, %s525_s4  }
 0x119   :  { %514 = dma.done.wait [#allocation4], 128  }
 0x11a   :  { %515 = vsyncadd [#allocation4], 4294967168 }
 0x11b   :  { %358 = vsyncpa [#allocation3], 1 }
 0x11c   :  { %359 = vsyncpa [#allocation6], 1 }
 0x11d   :  { %360 = vsyncpa [#allocation4], 1 }

</bundles_post_ra>
